<compile_context>
chip_gen: v7x
topology: tpu7x:2x2x1
jax: 0.10.0
libtpu: 0.0.40
codegen_flags: <defaults>
</compile_context>

<pallas_src>
import jax
import jax.numpy as jnp
from jax import lax
from jax.experimental import pallas as pl
from jax.experimental.pallas import tpu as pltpu

HIDDEN = 256
LANE = 128          # lane width; batch tiles are multiples of this
TB_MAX = 2048       # max batch-tile rows per grid step


def _round_up(x, m):
    return ((x + m - 1) // m) * m


def critic_mlp_kernel(x_ref,
                      w1_ref, b1_ref,
                      w2_ref, b2_ref,
                      w3_ref, b3_ref,
                      w4_ref, b4_ref,
                      o_ref):
    # Layer 1: (TB, D) @ (D, 256) + (1, 256) -> ReLU   (bf16 MXU, f32 acc)
    h = jnp.dot(x_ref[...].astype(jnp.bfloat16), w1_ref[...],
                preferred_element_type=jnp.float32)
    h = jnp.maximum(h + b1_ref[...], 0.0)
    # Layer 2
    h = jnp.dot(h.astype(jnp.bfloat16), w2_ref[...],
                preferred_element_type=jnp.float32)
    h = jnp.maximum(h + b2_ref[...], 0.0)
    # Layer 3
    h = jnp.dot(h.astype(jnp.bfloat16), w3_ref[...],
                preferred_element_type=jnp.float32)
    h = jnp.maximum(h + b3_ref[...], 0.0)
    # Layer 4: (1, 256) contracted with (TB, 256) over the hidden dim
    # -> (1, TB), i.e. batch lands on the lane axis (lane-dense store,
    # no zero-padded output columns).
    y = lax.dot_general(w4_ref[...], h.astype(jnp.bfloat16),
                        dimension_numbers=(((1,), (1,)), ((), ())),
                        preferred_element_type=jnp.float32)
    o_ref[...] = (y + b4_ref[...]).astype(o_ref.dtype)


def critic_network2_forward(states, kernel_params):
    """states: (B, state_dim) float32 -> (B, 1) float32.

    `kernel_params` must come from prepare_params() (bf16 weights, f32 biases,
    final layer packed as a (1, 256) row + (1, 1) bias).
    """
    w1, b1, w2, b2, w3, b3, w4r, b4 = kernel_params
    B, D = states.shape

    # --- batch tiling ---------------------------------------------------
    # Pad only to a multiple of 128 (lane width of the output row); pick the
    # tile count so unlucky batch sizes don't double the work, and force >= 2
    # tiles for large batches so both v7x TensorCores get a share.
    B_pad = _round_up(max(B, 1), LANE)
    n_tiles = -(-B_pad // TB_MAX)
    if n_tiles == 1 and B_pad >= 1024:
        n_tiles = 2
    TB = _round_up(-(-B_pad // n_tiles), LANE)
    B_pad = TB * n_tiles

    if B_pad != B:
        states = jnp.pad(states, ((0, B_pad - B), (0, 0)))

    x_spec = pl.BlockSpec((TB, D), lambda i: (i, 0))
    # Output is a single (1, B_pad) row; grid step i writes lanes [i*TB, (i+1)*TB).
    o_spec = pl.BlockSpec((1, TB), lambda i: (0, i))
    # Weights/biases: constant index_map -> DMA'd once, VMEM-resident.
    res = lambda shape: pl.BlockSpec(shape, lambda i: (0, 0))

    flops = 2 * B_pad * (D * HIDDEN + 2 * HIDDEN * HIDDEN + HIDDEN)
    bytes_accessed = (4 * B_pad * D                                   # x (f32)
                      + 4 * B_pad                                     # out (f32)
                      + 2 * (D * HIDDEN + 2 * HIDDEN * HIDDEN + HIDDEN)  # bf16 W
                      + 4 * (3 * HIDDEN + 1))                         # f32 biases

    out = pl.pallas_call(
        critic_mlp_kernel,
        out_shape=jax.ShapeDtypeStruct((1, B_pad), jnp.float32),
        grid=(n_tiles,),
        in_specs=[
            x_spec,
            res((D, HIDDEN)), res((1, HIDDEN)),
            res((HIDDEN, HIDDEN)), res((1, HIDDEN)),
            res((HIDDEN, HIDDEN)), res((1, HIDDEN)),
            res((1, HIDDEN)), res((1, 1)),
        ],
        out_specs=o_spec,
        compiler_params=pltpu.CompilerParams(
            dimension_semantics=("parallel",),
            vmem_limit_bytes=32 << 20,
        ),
        cost_estimate=pl.CostEstimate(
            flops=flops, transcendentals=0, bytes_accessed=bytes_accessed),
    )(states, w1, b1, w2, b2, w3, b3, w4r, b4)

    return out[0, :B].reshape(B, 1)


def init_params(key, state_dim):
    """Deterministic f32 init mimicking torch.nn.Linear (uniform +/- 1/sqrt(fan_in)).

    Weights are stored as (in_features, out_features).
    """
    dims = [(state_dim, HIDDEN), (HIDDEN, HIDDEN), (HIDDEN, HIDDEN), (HIDDEN, 1)]
    params = []
    keys = jax.random.split(key, 2 * len(dims))
    for i, (fan_in, fan_out) in enumerate(dims):
        bound = 1.0 / (fan_in ** 0.5)
        w = jax.random.uniform(keys[2 * i], (fan_in, fan_out),
                               minval=-bound, maxval=bound, dtype=jnp.float32)
        b = jax.random.uniform(keys[2 * i + 1], (1, fan_out),
                               minval=-bound, maxval=bound, dtype=jnp.float32)
        params += [w, b]
    return tuple(params)


def prepare_params(params):
    """One-time packing for the kernel (hoisted out of the per-call path):
    bf16 weights (bf16 MXU + halved weight DMA), f32 biases, and the final
    (256, 1) weight stored as a (1, 256) bf16 row with a (1, 1) f32 bias."""
    w1, b1, w2, b2, w3, b3, w4, b4 = params
    return (w1.astype(jnp.bfloat16), b1,
            w2.astype(jnp.bfloat16), b2,
            w3.astype(jnp.bfloat16), b3,
            w4.astype(jnp.bfloat16).reshape(1, HIDDEN),
            b4.reshape(1, 1))


def reference_forward(states, params):
    """Pure f32 reference (kernel uses bf16 MXU operands -> loose tolerance)."""
    w1, b1, w2, b2, w3, b3, w4, b4 = params
    h = jnp.maximum(states @ w1 + b1, 0.0)
    h = jnp.maximum(h @ w2 + b2, 0.0)
    h = jnp.maximum(h @ w3 + b3, 0.0)
    return h @ w4 + b4


if __name__ == "__main__":
    key = jax.random.PRNGKey(0)
    k_param, k_x = jax.random.split(key)

    batch, state_dim = 8, 32  # state_shape = (32,)
    params = init_params(k_param, state_dim)
    kparams = prepare_params(params)          # packed once, reused every call

    states = jax.random.normal(k_x, (batch, state_dim), dtype=jnp.float32)
    out = jax.block_until_ready(critic_network2_forward(states, kparams))
    ref = reference_forward(states, params)
    assert out.shape == (batch, 1), out.shape
    assert jnp.allclose(out, ref, atol=5e-2, rtol=5e-2), "mismatch vs reference"

    # Ragged batch (single tile, padded rows sliced off).
    states2 = jax.random.normal(jax.random.PRNGKey(1), (37, state_dim),
                                dtype=jnp.float32)
    out2 = jax.block_until_ready(critic_network2_forward(states2, kparams))
    ref2 = reference_forward(states2, params)
    assert out2.shape == (37, 1), out2.shape
    assert jnp.allclose(out2, ref2, atol=5e-2, rtol=5e-2), "mismatch (ragged B)"

    # Multi-tile path (forced >=2 grid tiles; validates lane-blocked output).
    states3 = jax.random.normal(jax.random.PRNGKey(2), (1025, state_dim),
                                dtype=jnp.float32)
    out3 = jax.block_until_ready(critic_network2_forward(states3, kparams))
    ref3 = reference_forward(states3, params)
    assert out3.shape == (1025, 1), out3.shape
    assert jnp.allclose(out3, ref3, atol=5e-2, rtol=5e-2), "mismatch (multi-tile)"

    print("KERNEL_OK")
</pallas_src>

<mosaic_0001>
module attributes {stable_mosaic.version = 11 : i64} {
  func.func @critic_mlp_kernel(%arg0: i32, %arg1: memref<128x32xf32, #tpu.memory_space<vmem>>, %arg2: memref<32x256xbf16, #tpu.memory_space<vmem>>, %arg3: memref<1x256xf32, #tpu.memory_space<vmem>>, %arg4: memref<256x256xbf16, #tpu.memory_space<vmem>>, %arg5: memref<1x256xf32, #tpu.memory_space<vmem>>, %arg6: memref<256x256xbf16, #tpu.memory_space<vmem>>, %arg7: memref<1x256xf32, #tpu.memory_space<vmem>>, %arg8: memref<1x256xbf16, #tpu.memory_space<vmem>>, %arg9: memref<1x1xf32, #tpu.memory_space<vmem>>, %arg10: memref<1x128xf32, #tpu.memory_space<vmem>>) attributes {dimension_semantics = [#tpu.dimension_semantics<parallel>], iteration_bounds = array<i64: 1>, scalar_prefetch = 0 : i64, scratch_operands = 0 : i64, tpu.core_type = #tpu.core_type<tc>, window_params = [{transform_indices = @transform_0, window_bounds = array<i64: 128, 32>}, {pipeline_mode = #tpu.pipeline_mode<synchronous>, transform_indices = @transform_1, window_bounds = array<i64: 32, 256>}, {pipeline_mode = #tpu.pipeline_mode<synchronous>, transform_indices = @transform_2, window_bounds = array<i64: 1, 256>}, {pipeline_mode = #tpu.pipeline_mode<synchronous>, transform_indices = @transform_3, window_bounds = array<i64: 256, 256>}, {pipeline_mode = #tpu.pipeline_mode<synchronous>, transform_indices = @transform_4, window_bounds = array<i64: 1, 256>}, {pipeline_mode = #tpu.pipeline_mode<synchronous>, transform_indices = @transform_5, window_bounds = array<i64: 256, 256>}, {pipeline_mode = #tpu.pipeline_mode<synchronous>, transform_indices = @transform_6, window_bounds = array<i64: 1, 256>}, {pipeline_mode = #tpu.pipeline_mode<synchronous>, transform_indices = @transform_7, window_bounds = array<i64: 1, 256>}, {pipeline_mode = #tpu.pipeline_mode<synchronous>, transform_indices = @transform_8, window_bounds = array<i64: 1, 1>}, {transform_indices = @transform_9, window_bounds = array<i64: 1, 128>}]} {
    %c0 = arith.constant 0 : index
    %c0_0 = arith.constant 0 : index
    %0 = vector.load %arg1[%c0, %c0_0] : memref<128x32xf32, #tpu.memory_space<vmem>>, vector<128x32xf32>
    %1 = arith.truncf %0 : vector<128x32xf32> to vector<128x32xbf16>
    %c0_1 = arith.constant 0 : index
    %c0_2 = arith.constant 0 : index
    %2 = vector.load %arg2[%c0_1, %c0_2] : memref<32x256xbf16, #tpu.memory_space<vmem>>, vector<32x256xbf16>
    %cst = arith.constant dense<0.000000e+00> : vector<128x256xf32>
    %3 = tpu.matmul %1, %2, %cst {dimension_numbers = #tpu.dot_dimension_numbers<[1], [0], [0], [1], [0, 0, 1, 1], [], []>} : vector<128x32xbf16>, vector<32x256xbf16>, vector<128x256xf32> -> vector<128x256xf32>
    %c0_3 = arith.constant 0 : index
    %c0_4 = arith.constant 0 : index
    %4 = vector.load %arg3[%c0_3, %c0_4] : memref<1x256xf32, #tpu.memory_space<vmem>>, vector<1x256xf32>
    %5 = vector.broadcast %4 : vector<1x256xf32> to vector<128x256xf32>
    %6 = arith.addf %3, %5 : vector<128x256xf32>
    %cst_5 = arith.constant 0.000000e+00 : f32
    %7 = vector.broadcast %cst_5 : f32 to vector<128x256xf32>
    %8 = arith.maximumf %6, %7 : vector<128x256xf32>
    %9 = arith.truncf %8 : vector<128x256xf32> to vector<128x256xbf16>
    %c0_6 = arith.constant 0 : index
    %c0_7 = arith.constant 0 : index
    %10 = vector.load %arg4[%c0_6, %c0_7] : memref<256x256xbf16, #tpu.memory_space<vmem>>, vector<256x256xbf16>
    %cst_8 = arith.constant dense<0.000000e+00> : vector<128x256xf32>
    %11 = tpu.matmul %9, %10, %cst_8 {dimension_numbers = #tpu.dot_dimension_numbers<[1], [0], [0], [1], [0, 0, 1, 1], [], []>} : vector<128x256xbf16>, vector<256x256xbf16>, vector<128x256xf32> -> vector<128x256xf32>
    %c0_9 = arith.constant 0 : index
    %c0_10 = arith.constant 0 : index
    %12 = vector.load %arg5[%c0_9, %c0_10] : memref<1x256xf32, #tpu.memory_space<vmem>>, vector<1x256xf32>
    %13 = vector.broadcast %12 : vector<1x256xf32> to vector<128x256xf32>
    %14 = arith.addf %11, %13 : vector<128x256xf32>
    %cst_11 = arith.constant 0.000000e+00 : f32
    %15 = vector.broadcast %cst_11 : f32 to vector<128x256xf32>
    %16 = arith.maximumf %14, %15 : vector<128x256xf32>
    %17 = arith.truncf %16 : vector<128x256xf32> to vector<128x256xbf16>
    %c0_12 = arith.constant 0 : index
    %c0_13 = arith.constant 0 : index
    %18 = vector.load %arg6[%c0_12, %c0_13] : memref<256x256xbf16, #tpu.memory_space<vmem>>, vector<256x256xbf16>
    %cst_14 = arith.constant dense<0.000000e+00> : vector<128x256xf32>
    %19 = tpu.matmul %17, %18, %cst_14 {dimension_numbers = #tpu.dot_dimension_numbers<[1], [0], [0], [1], [0, 0, 1, 1], [], []>} : vector<128x256xbf16>, vector<256x256xbf16>, vector<128x256xf32> -> vector<128x256xf32>
    %c0_15 = arith.constant 0 : index
    %c0_16 = arith.constant 0 : index
    %20 = vector.load %arg7[%c0_15, %c0_16] : memref<1x256xf32, #tpu.memory_space<vmem>>, vector<1x256xf32>
    %21 = vector.broadcast %20 : vector<1x256xf32> to vector<128x256xf32>
    %22 = arith.addf %19, %21 : vector<128x256xf32>
    %cst_17 = arith.constant 0.000000e+00 : f32
    %23 = vector.broadcast %cst_17 : f32 to vector<128x256xf32>
    %24 = arith.maximumf %22, %23 : vector<128x256xf32>
    %c0_18 = arith.constant 0 : index
    %c0_19 = arith.constant 0 : index
    %25 = vector.load %arg8[%c0_18, %c0_19] : memref<1x256xbf16, #tpu.memory_space<vmem>>, vector<1x256xbf16>
    %26 = arith.truncf %24 : vector<128x256xf32> to vector<128x256xbf16>
    %cst_20 = arith.constant dense<0.000000e+00> : vector<1x128xf32>
    %27 = tpu.matmul %25, %26, %cst_20 {dimension_numbers = #tpu.dot_dimension_numbers<[1], [1], [0], [0], [0, 0, 1, 0], [], []>} : vector<1x256xbf16>, vector<128x256xbf16>, vector<1x128xf32> -> vector<1x128xf32>
    %c0_21 = arith.constant 0 : index
    %c0_22 = arith.constant 0 : index
    %28 = vector.load %arg9[%c0_21, %c0_22] : memref<1x1xf32, #tpu.memory_space<vmem>>, vector<1x1xf32>
    %29 = vector.broadcast %28 : vector<1x1xf32> to vector<1x128xf32>
    %30 = arith.addf %27, %29 : vector<1x128xf32>
    %c0_23 = arith.constant 0 : index
    %c0_24 = arith.constant 0 : index
    %31 = vector.load %arg10[%c0_23, %c0_24] : memref<1x128xf32, #tpu.memory_space<vmem>>, vector<1x128xf32>
    tpu.vector_store %arg10[%c0_23, %c0_24], %30 {strides = array<i32>} : memref<1x128xf32, #tpu.memory_space<vmem>>, vector<1x128xf32>,
    return
  }
  func.func @transform_0(%arg0: i32) -> (i32, i32) {
    %c0_i32 = arith.constant 0 : i32
    %c0_i32_0 = arith.constant 0 : i32
    return %arg0, %c0_i32 : i32, i32
  }
  func.func @transform_1(%arg0: i32) -> (i32, i32) {
    %c0_i32 = arith.constant 0 : i32
    %c0_i32_0 = arith.constant 0 : i32
    %c0_i32_1 = arith.constant 0 : i32
    return %c0_i32, %c0_i32_0 : i32, i32
  }
  func.func @transform_2(%arg0: i32) -> (i32, i32) {
    %c0_i32 = arith.constant 0 : i32
    %c0_i32_0 = arith.constant 0 : i32
    %c0_i32_1 = arith.constant 0 : i32
    return %c0_i32, %c0_i32_0 : i32, i32
  }
  func.func @transform_3(%arg0: i32) -> (i32, i32) {
    %c0_i32 = arith.constant 0 : i32
    %c0_i32_0 = arith.constant 0 : i32
    %c0_i32_1 = arith.constant 0 : i32
    return %c0_i32, %c0_i32_0 : i32, i32
  }
  func.func @transform_4(%arg0: i32) -> (i32, i32) {
    %c0_i32 = arith.constant 0 : i32
    %c0_i32_0 = arith.constant 0 : i32
    %c0_i32_1 = arith.constant 0 : i32
    return %c0_i32, %c0_i32_0 : i32, i32
  }
  func.func @transform_5(%arg0: i32) -> (i32, i32) {
    %c0_i32 = arith.constant 0 : i32
    %c0_i32_0 = arith.constant 0 : i32
    %c0_i32_1 = arith.constant 0 : i32
    return %c0_i32, %c0_i32_0 : i32, i32
  }
  func.func @transform_6(%arg0: i32) -> (i32, i32) {
    %c0_i32 = arith.constant 0 : i32
    %c0_i32_0 = arith.constant 0 : i32
    %c0_i32_1 = arith.constant 0 : i32
    return %c0_i32, %c0_i32_0 : i32, i32
  }
  func.func @transform_7(%arg0: i32) -> (i32, i32) {
    %c0_i32 = arith.constant 0 : i32
    %c0_i32_0 = arith.constant 0 : i32
    %c0_i32_1 = arith.constant 0 : i32
    return %c0_i32, %c0_i32_0 : i32, i32
  }
  func.func @transform_8(%arg0: i32) -> (i32, i32) {
    %c0_i32 = arith.constant 0 : i32
    %c0_i32_0 = arith.constant 0 : i32
    %c0_i32_1 = arith.constant 0 : i32
    return %c0_i32, %c0_i32_0 : i32, i32
  }
  func.func @transform_9(%arg0: i32) -> (i32, i32) {
    %c0_i32 = arith.constant 0 : i32
    %c0_i32_0 = arith.constant 0 : i32
    return %c0_i32, %arg0 : i32, i32
  }
}

</mosaic_0001>

<bundles_post_ra>
// kernel: tpu_custom_call.1
= control target key start
LH: loop header
LB: loop body
LE: loop exit
PB: predicated region body
PF: predicated region fallthrough
CT: control target
= control target key end

     0   :  { %s1713_s0 = inlined_call_operand.vmem [shape: f32[128,32], index: 0, kind: input, shape index: {}]   ;;  %s1714_s1 = inlined_call_operand.vmem [shape: bf16[32,256], index: 1, kind: input, shape index: {}]   ;;  %s1715_s2 = inlined_call_operand.vmem [shape: f32[1,256], index: 2, kind: input, shape index: {}]   ;;  %s1716_s3 = inlined_call_operand.hbm [shape: bf16[256,256], index: 3, kind: input, shape index: {}]   ;;  %s1717_s4 = inlined_call_operand.vmem [shape: f32[1,256], index: 4, kind: input, shape index: {}]   ;;  %s1718_s5 = inlined_call_operand.hbm [shape: bf16[256,256], index: 5, kind: input, shape index: {}]   ;;  %s1719_s6 = inlined_call_operand.vmem [shape: f32[1,256], index: 6, kind: input, shape index: {}]   ;;  %s1720_s7 = inlined_call_operand.vmem [shape: bf16[1,256], index: 7, kind: input, shape index: {}]   ;;  %s1721_s8 = inlined_call_operand.<no memory space> [shape: f32[1,1], index: 8, kind: input, shape index: {}]   ;;  %s1722_s9 = inlined_call_operand.hbm [shape: f32[1,128], index: 9, kind: output, shape index: {}]  }
   0x1   :  { %v14_v0 = vstv %s1721_s8 }
   0x2   :  { %15 = vst [vmem:[#allocation2] sm:$0x1] %v14_v0 }
   0x3   :  { %16 = vsyncpa [#allocation4], 0 }
   0x4   :  { %17 = vsyncpa [#allocation7], 0 }
   0x5   :  { %18 = vsyncpa [#allocation5], 0  ;;  %s1392_s11 = smov [#allocation3]   ;;  %s1320_s15 = scalar_lea.hbm %s1716_s3, 4096 }
   0x6   :  { %s30_s12 = sshll.u32 %s1392_s11, 4  ;;  %p1321_p0 = scmp.ne.s32.totalorder %s1716_s3, %s1320_s15  ;;  %s31_s12 = int_to_ptr.vmem [resolvable:$true] %s30_s12 }
   0x7   :  { %p1324_p1 = scmp.lt.u32.totalorder %s1320_s15, %s1716_s3 }
   0x9   :  { %p1326_p2 = pnand %p1324_p1, %p1321_p0 }
   0xb   :  { %1329 = shalt.err (!%p1326_p2)
}
   0xc   :  { %s1330_s8 = scalar_lea.vmem %s31_s12, 4096  ;;  %p1335_p4 = scmp.lt.s32.totalorder %s31_s12, %s31_s12 }
   0xd   :  { %p1331_p3 = scmp.ne.s32.totalorder %s31_s12, %s1330_s8  ;;  %p1336_p5 = scmp.lt.s32.totalorder %s1330_s8, %s1330_s8 }
   0xf   :  { %p1337_p6 = por %p1336_p5, %p1335_p4 }
  0x11   :  { %p1338_p7 = pnand %p1337_p6, %p1331_p3 }
  0x13   :  { %1341 = shalt.err (!%p1338_p7)
}
  0x14   :  { %s1393_s20 = smov 128   ;;  %s1394_s21 = smov 8  }
  0x15   :  { %36 = dma.hbm_to_vmem [thread:$0]  %s1716_s3, 4096, %s31_s12, [#allocation4], %s1393_s20, %s1393_s20, %s1394_s21  }
  0x16   :  { %s1395_s24 = smov [#allocation6]   ;;  %s1342_s28 = scalar_lea.hbm %s1718_s5, 4096 }
  0x17   :  { %s44_s25 = sshll.u32 %s1395_s24, 4  ;;  %p1343_p8 = scmp.ne.s32.totalorder %s1718_s5, %s1342_s28  ;;  %s45_s25 = int_to_ptr.vmem [resolvable:$true] %s44_s25 }
  0x18   :  { %p1346_p9 = scmp.lt.u32.totalorder %s1342_s28, %s1718_s5 }
  0x1a   :  { %p1348_p10 = pnand %p1346_p9, %p1343_p8 }
  0x1c   :  { %1351 = shalt.err (!%p1348_p10)
}
  0x1d   :  { %s1352_s13 = scalar_lea.vmem %s45_s25, 4096  ;;  %p1357_p12 = scmp.lt.s32.totalorder %s45_s25, %s45_s25 }
  0x1e   :  { %p1353_p11 = scmp.ne.s32.totalorder %s45_s25, %s1352_s13  ;;  %p1358_p13 = scmp.lt.s32.totalorder %s1352_s13, %s1352_s13 }
  0x20   :  { %p1359_p0 = por %p1358_p13, %p1357_p12 }
  0x22   :  { %p1360_p1 = pnand %p1359_p0, %p1353_p11 }
  0x24   :  { %1363 = shalt.err (!%p1360_p1)
}
  0x25   :  { %50 = dma.hbm_to_vmem [thread:$0]  %s1718_s5, 4096, %s45_s25, [#allocation7], %s1393_s20, %s1393_s20, %s1394_s21  }
  0x26   :  { %1386 = dma.done.wait [#allocation4], 4096  }
  0x27   :  { %1387 = vsyncadd [#allocation4], 4294963200 }
  0x28   :  { %1388 = dma.done.wait [#allocation7], 4096  }
  0x29   :  { %1389 = vsyncadd [#allocation7], 4294963200  ;;  %v1396_v1 = vmov 0   ;;  %v1218_v2 = vld [vmem:[%s1714_s1 + $0x4] ss:$8 sps:$4 sm:$0xff]   ;;  %vm124_vm0 = vcmask 261120  }
  0x2a   :  { %181 = vmatprep.mubr.bf16.mxu0 %v1396_v1  ;;  %1217 = vset.pattern.permute.xlu0 %v1396_v1  ;;  %v1220_v3 = vld [vmem:[%s1714_s1] ss:$8 sps:$4 sm:$0xff]   ;;  %v1221_v4 = vld [vmem:[%s1714_s1 + $0x14] ss:$8 sps:$4 sm:$0xff]   ;;  %v1223_v5 = vld [vmem:[%s1714_s1 + $0x10] ss:$8 sps:$4 sm:$0xff]  }
  0x2b   :  { %149 = vmatprep.subr.bf16.mxu0 %v1218_v2  ;;  %v64_v6 = vld [vmem:[%s1713_s0] sm:$0xff]  ;;  %v65_v7 = vld [vmem:[%s1713_s0 + $0x8] sm:$0xff]  ;;  %v66_v11 = vld [vmem:[%s1713_s0 + $0x10] sm:$0xff] }
  0x2c   :  { %150 = vmatpush1.bf16.msra.mxu0 %v1220_v3  ;;  %v80_v8 = vpack.c.bf16 %v65_v7, %v64_v6  ;;  %v1224_v9 = vld [vmem:[#allocation3 + $0x4] ss:$8 sps:$4 sm:$0xff]   ;;  %v1226_v10 = vld [vmem:[#allocation3] ss:$8 sps:$4 sm:$0xff]   ;;  %v1227_v12 = vld [vmem:[#allocation3 + $0x14] ss:$8 sps:$4 sm:$0xff]  }
  0x2d   :  { %151 = vmatprep.subr.bf16.mxu0 %v1221_v4  ;;  %514 = vmatprep.subr.bf16.mxu1 %v1224_v9  ;;  %v67_v13 = vld [vmem:[%s1713_s0 + $0x18] sm:$0xff]  ;;  %v1230_v15 = vld [vmem:[#allocation3 + $0x24] ss:$8 sps:$4 sm:$0xff]   ;;  %v1232_v17 = vld [vmem:[#allocation3 + $0x20] ss:$8 sps:$4 sm:$0xff]  }
  0x2e   :  { %515 = vmatpush1.bf16.msra.mxu1 %v1226_v10  ;;  %v1229_v14 = vld [vmem:[#allocation3 + $0x10] ss:$8 sps:$4 sm:$0xff]   ;;  %v81_v16 = vpack.c.bf16 %v67_v13, %v66_v11  ;;  %v1233_v18 = vld [vmem:[#allocation3 + $0x34] ss:$8 sps:$4 sm:$0xff]   ;;  %v69_v20 = vld [vmem:[%s1713_s0 + $0x28] sm:$0xff] }
  0x2f   :  { %516 = vmatprep.subr.bf16.mxu1 %v1227_v12  ;;  %v68_v19 = vld [vmem:[%s1713_s0 + $0x20] sm:$0xff]  ;;  %v1235_v21 = vld [vmem:[#allocation3 + $0x30] ss:$8 sps:$4 sm:$0xff]   ;;  %v73_v34 = vld [vmem:[%s1713_s0 + $0x48] sm:$0xff] }
  0x30   :  { %152 = vmatpush1.bf16.msra.mxu0 %v1223_v5  ;;  %v1236_v22 = vld [vmem:[#allocation3 + $0x44] ss:$8 sps:$4 sm:$0xff]   ;;  %v82_v23 = vpack.c.bf16 %v69_v20, %v68_v19  ;;  %v1238_v24 = vld [vmem:[#allocation3 + $0x40] ss:$8 sps:$4 sm:$0xff]   ;;  %v1239_v25 = vld [vmem:[#allocation3 + $0x54] ss:$8 sps:$4 sm:$0xff]  }
  0x31   :  { %v70_v26 = vld [vmem:[%s1713_s0 + $0x30] sm:$0xff]  ;;  %v71_v27 = vld [vmem:[%s1713_s0 + $0x38] sm:$0xff]  ;;  %v1244_v30 = vld [vmem:[#allocation3 + $0x60] ss:$8 sps:$4 sm:$0xff]  }
  0x32   :  { %517 = vmatpush1.bf16.msra.mxu1 %v1229_v14  ;;  %v1241_v28 = vld [vmem:[#allocation3 + $0x50] ss:$8 sps:$4 sm:$0xff]   ;;  %v1242_v29 = vld [vmem:[#allocation3 + $0x64] ss:$8 sps:$4 sm:$0xff]   ;;  %v83_v31 = vpack.c.bf16 %v71_v27, %v70_v26  ;;  %v1245_v32 = vld [vmem:[#allocation3 + $0x74] ss:$8 sps:$4 sm:$0xff]  }
  0x33   :  { %1137 = vmatmul.mubr.msk.bf16.vlgmr.msra.gmra.mrb[0].mxu0 %vm124_vm0, %v80_v8  ;;  %518 = vmatprep.subr.bf16.mxu1 %v1230_v15  ;;  %v72_v33 = vld [vmem:[%s1713_s0 + $0x40] sm:$0xff]  ;;  %v1247_v35 = vld [vmem:[#allocation3 + $0x70] ss:$8 sps:$4 sm:$0xff]   ;;  %v77_v48 = vld [vmem:[%s1713_s0 + $0x68] sm:$0xff] }
  0x34   :  { %191 = vmatprep.mubr.bf16.mxu0 %v1396_v1  ;;  %v1248_v36 = vld [vmem:[#allocation3 + $0x84] ss:$8 sps:$4 sm:$0xff]   ;;  %v84_v37 = vpack.c.bf16 %v73_v34, %v72_v33  ;;  %v1250_v38 = vld [vmem:[#allocation3 + $0x80] ss:$8 sps:$4 sm:$0xff]   ;;  %v1251_v39 = vld [vmem:[#allocation3 + $0x94] ss:$8 sps:$4 sm:$0xff]  }
  0x35   :  { %v74_v40 = vld [vmem:[%s1713_s0 + $0x50] sm:$0xff]  ;;  %v75_v41 = vld [vmem:[%s1713_s0 + $0x58] sm:$0xff]  ;;  %v1256_v45 = vld [vmem:[#allocation3 + $0xa0] ss:$8 sps:$4 sm:$0xff]  }
  0x36   :  { %519 = vmatpush1.bf16.msra.mxu1 %v1232_v17  ;;  %v1253_v42 = vld [vmem:[#allocation3 + $0x90] ss:$8 sps:$4 sm:$0xff]   ;;  %v1254_v43 = vld [vmem:[#allocation3 + $0xa4] ss:$8 sps:$4 sm:$0xff]   ;;  %v85_v44 = vpack.c.bf16 %v75_v41, %v74_v40  ;;  %v1257_v46 = vld [vmem:[#allocation3 + $0xb4] ss:$8 sps:$4 sm:$0xff]  }
  0x37   :  { %520 = vmatprep.subr.bf16.mxu1 %v1233_v18  ;;  %v76_v47 = vld [vmem:[%s1713_s0 + $0x60] sm:$0xff]  ;;  %v1259_v49 = vld [vmem:[#allocation3 + $0xb0] ss:$8 sps:$4 sm:$0xff]  }
  0x38   :  { %v1260_v50 = vld [vmem:[#allocation3 + $0xc4] ss:$8 sps:$4 sm:$0xff]   ;;  %v86_v51 = vpack.c.bf16 %v77_v48, %v76_v47  ;;  %v1262_v52 = vld [vmem:[#allocation3 + $0xc0] ss:$8 sps:$4 sm:$0xff]   ;;  %v1263_v53 = vld [vmem:[#allocation3 + $0xd4] ss:$8 sps:$4 sm:$0xff]  }
  0x39   :  { %v78_v54 = vld [vmem:[%s1713_s0 + $0x70] sm:$0xff]  ;;  %v79_v55 = vld [vmem:[%s1713_s0 + $0x78] sm:$0xff]  ;;  %v1268_v59 = vld [vmem:[#allocation3 + $0xe0] ss:$8 sps:$4 sm:$0xff]  }
  0x3a   :  { %521 = vmatpush1.bf16.msra.mxu1 %v1235_v21  ;;  %v87_v56 = vpack.c.bf16 %v79_v55, %v78_v54  ;;  %v1265_v57 = vld [vmem:[#allocation3 + $0xd0] ss:$8 sps:$4 sm:$0xff]   ;;  %v1266_v58 = vld [vmem:[#allocation3 + $0xe4] ss:$8 sps:$4 sm:$0xff]   ;;  %v1269_v60 = vld [vmem:[#allocation3 + $0xf4] ss:$8 sps:$4 sm:$0xff]  }
  0x3b   :  { %1138 = vmatmul.mubr.msk.bf16.gmra.mrb[4].mxu0 %vm124_vm0, %v81_v16  ;;  %522 = vmatprep.subr.bf16.mxu1 %v1236_v22  ;;  %v1271_v61 = vld [vmem:[#allocation3 + $0xf0] ss:$8 sps:$4 sm:$0xff]   ;;  %v1272_v62 = vld [vmem:[#allocation6] ss:$8 sps:$4 sm:$0xff]   ;;  %v1274_v63 = vld [vmem:[#allocation6 + $0x4] ss:$8 sps:$4 sm:$0xff]  }
  0x3c   :  { %201 = vmatprep.mubr.bf16.mxu0 %v1396_v1  ;;  %v1277_v0 = vld [vmem:[#allocation6 + $0x14] ss:$8 sps:$4 sm:$0xff]   ;;  %879 = vmatprep.subr.bf16.mxu0 %v1274_v63  ;;  %v1280_v2 = vld [vmem:[#allocation6 + $0x24] ss:$8 sps:$4 sm:$0xff]   ;;  %v1278_v3 = vld [vmem:[#allocation6 + $0x20] ss:$8 sps:$4 sm:$0xff]  }
  0x3d   :  { %880 = vmatpush1.bf16.msra.mxu0 %v1272_v62  ;;  %v1283_v4 = vld [vmem:[#allocation6 + $0x34] ss:$8 sps:$4 sm:$0xff]   ;;  %v1281_v5 = vld [vmem:[#allocation6 + $0x30] ss:$8 sps:$4 sm:$0xff]   ;;  %v1286_v6 = vld [vmem:[#allocation6 + $0x44] ss:$8 sps:$4 sm:$0xff]  }
  0x3e   :  { %523 = vmatpush1.bf16.msra.mxu1 %v1238_v24  ;;  %881 = vmatprep.subr.bf16.mxu0 %v1277_v0  ;;  %v1284_v7 = vld [vmem:[#allocation6 + $0x40] ss:$8 sps:$4 sm:$0xff]   ;;  %v1289_v8 = vld [vmem:[#allocation6 + $0x54] ss:$8 sps:$4 sm:$0xff]   ;;  %v1287_v9 = vld [vmem:[#allocation6 + $0x50] ss:$8 sps:$4 sm:$0xff]  }
  0x3f   :  { %524 = vmatprep.subr.bf16.mxu1 %v1239_v25  ;;  %v1292_v10 = vld [vmem:[#allocation6 + $0x64] ss:$8 sps:$4 sm:$0xff]   ;;  %v1290_v11 = vld [vmem:[#allocation6 + $0x60] ss:$8 sps:$4 sm:$0xff]   ;;  %v1295_v12 = vld [vmem:[#allocation6 + $0x74] ss:$8 sps:$4 sm:$0xff]  }
  0x40   :  { %v1293_v13 = vld [vmem:[#allocation6 + $0x70] ss:$8 sps:$4 sm:$0xff]   ;;  %v1298_v14 = vld [vmem:[#allocation6 + $0x84] ss:$8 sps:$4 sm:$0xff]   ;;  %v1296_v15 = vld [vmem:[#allocation6 + $0x80] ss:$8 sps:$4 sm:$0xff]  }
  0x41   :  { %v1301_v16 = vld [vmem:[#allocation6 + $0x94] ss:$8 sps:$4 sm:$0xff]   ;;  %v1299_v17 = vld [vmem:[#allocation6 + $0x90] ss:$8 sps:$4 sm:$0xff]   ;;  %v1304_v18 = vld [vmem:[#allocation6 + $0xa4] ss:$8 sps:$4 sm:$0xff]  }
  0x42   :  { %525 = vmatpush1.bf16.msra.mxu1 %v1241_v28  ;;  %v1302_v19 = vld [vmem:[#allocation6 + $0xa0] ss:$8 sps:$4 sm:$0xff]   ;;  %v1307_v20 = vld [vmem:[#allocation6 + $0xb4] ss:$8 sps:$4 sm:$0xff]   ;;  %v1305_v21 = vld [vmem:[#allocation6 + $0xb0] ss:$8 sps:$4 sm:$0xff]  }
  0x43   :  { %1139 = vmatmul.mubr.msk.bf16.gmra.mrb[8].mxu0 %vm124_vm0, %v82_v23  ;;  %526 = vmatprep.subr.bf16.mxu1 %v1242_v29  ;;  %v1310_v22 = vld [vmem:[#allocation6 + $0xc4] ss:$8 sps:$4 sm:$0xff]   ;;  %v94_v23 = vlaneseq  ;;  %v1308_v24 = vld [vmem:[#allocation6 + $0xc0] ss:$8 sps:$4 sm:$0xff]   ;;  %v1313_v25 = vld [vmem:[#allocation6 + $0xd4] ss:$8 sps:$4 sm:$0xff]  }
  0x44   :  { %211 = vmatprep.mubr.bf16.mxu0 %v1396_v1  ;;  %v1311_v27 = vld [vmem:[#allocation6 + $0xd0] ss:$8 sps:$4 sm:$0xff]   ;;  %v92_v29 = vld [vmem:[%s1715_s2] sm:$0x3] }
  0x45   :  { %v1553_v26 = vshrl.u32 %v94_v23, 7 }
  0x46   :  { %527 = vmatpush1.bf16.msra.mxu1 %v1244_v30 }
  0x47   :  { %528 = vmatprep.subr.bf16.mxu1 %v1245_v32  ;;  %v1556_v28 = vsub.s32 0, %v1553_v26  ;;  %v1562_v30 = vsub.s32 1, %v1553_v26 }
  0x49   :  { %v1568_v32 = vrot.slane %v92_v29, %v1562_v30 }
  0x4a   :  { %529 = vmatpush1.bf16.msra.mxu1 %v1247_v35 }
  0x4b   :  { %1140 = vmatmul.mubr.msk.bf16.gmra.mrb[12].mxu0 %vm124_vm0, %v83_v31  ;;  %530 = vmatprep.subr.bf16.mxu1 %v1248_v36  ;;  %v1565_v31 = vrot.slane %v92_v29, %v1556_v28 }
  0x4c   :  { %221 = vmatprep.mubr.bf16.mxu0 %v1396_v1 }
  0x4e   :  { %531 = vmatpush1.bf16.msra.mxu1 %v1250_v38 }
  0x4f   :  { %532 = vmatprep.subr.bf16.mxu1 %v1251_v39 }
  0x52   :  { %533 = vmatpush1.bf16.msra.mxu1 %v1253_v42 }
  0x53   :  { %1141 = vmatmul.mubr.msk.bf16.gmra.mrb[16].mxu0 %vm124_vm0, %v84_v37  ;;  %534 = vmatprep.subr.bf16.mxu1 %v1254_v43 }
  0x54   :  { %231 = vmatprep.mubr.bf16.mxu0 %v1396_v1 }
  0x56   :  { %535 = vmatpush1.bf16.msra.mxu1 %v1256_v45 }
  0x57   :  { %536 = vmatprep.subr.bf16.mxu1 %v1257_v46 }
  0x5a   :  { %537 = vmatpush1.bf16.msra.mxu1 %v1259_v49 }
  0x5b   :  { %1142 = vmatmul.mubr.msk.bf16.gmra.mrb[20].mxu0 %vm124_vm0, %v85_v44  ;;  %538 = vmatprep.subr.bf16.mxu1 %v1260_v50 }
  0x5c   :  { %241 = vmatprep.mubr.bf16.mxu0 %v1396_v1 }
  0x5e   :  { %539 = vmatpush1.bf16.msra.mxu1 %v1262_v52 }
  0x5f   :  { %540 = vmatprep.subr.bf16.mxu1 %v1263_v53 }
  0x62   :  { %541 = vmatpush1.bf16.msra.mxu1 %v1265_v57 }
  0x63   :  { %1143 = vmatmul.mubr.msk.bf16.gmra.mrb[24].mxu0 %vm124_vm0, %v86_v51  ;;  %542 = vmatprep.subr.bf16.mxu1 %v1266_v58 }
  0x64   :  { %251 = vmatprep.mubr.bf16.mxu0 %v1396_v1  ;;  %v1275_v1 = vld [vmem:[#allocation6 + $0x10] ss:$8 sps:$4 sm:$0xff]  }
  0x65   :  { %882 = vmatpush1.bf16.msra.mxu0 %v1275_v1 }
  0x66   :  { %543 = vmatpush1.bf16.msra.mxu1 %v1268_v59  ;;  %883 = vmatprep.subr.bf16.mxu0 %v1280_v2 }
  0x67   :  { %544 = vmatprep.subr.bf16.mxu1 %v1269_v60 }
  0x69   :  { %884 = vmatpush1.bf16.msra.mxu0 %v1278_v3 }
  0x6a   :  { %545 = vmatpush1.bf16.msra.mxu1 %v1271_v61  ;;  %885 = vmatprep.subr.bf16.mxu0 %v1283_v4 }
  0x6b   :  { %1144 = vmatmul.mubr.msk.bf16.gmra.mrb[28].mxu0 %vm124_vm0, %v87_v56 }
  0x6d   :  { %886 = vmatpush1.bf16.msra.mxu0 %v1281_v5 }
  0x6e   :  { %887 = vmatprep.subr.bf16.mxu0 %v1286_v6 }
  0x71   :  { %888 = vmatpush1.bf16.msra.mxu0 %v1284_v7 }
  0x72   :  { %889 = vmatprep.subr.bf16.mxu0 %v1289_v8 }
  0x75   :  { %890 = vmatpush1.bf16.msra.mxu0 %v1287_v9 }
  0x76   :  { %891 = vmatprep.subr.bf16.mxu0 %v1292_v10 }
  0x79   :  { %892 = vmatpush1.bf16.msra.mxu0 %v1290_v11 }
  0x7a   :  { %893 = vmatprep.subr.bf16.mxu0 %v1295_v12 }
  0x7d   :  { %894 = vmatpush1.bf16.msra.mxu0 %v1293_v13 }
  0x7e   :  { %895 = vmatprep.subr.bf16.mxu0 %v1298_v14 }
  0x81   :  { %896 = vmatpush1.bf16.msra.mxu0 %v1296_v15 }
  0x82   :  { %897 = vmatprep.subr.bf16.mxu0 %v1301_v16 }
  0x85   :  { %898 = vmatpush1.bf16.msra.mxu0 %v1299_v17 }
  0x86   :  { %899 = vmatprep.subr.bf16.mxu0 %v1304_v18 }
  0x89   :  { %900 = vmatpush1.bf16.msra.mxu0 %v1302_v19 }
  0x8a   :  { %901 = vmatprep.subr.bf16.mxu0 %v1307_v20 }
  0x8d   :  { %902 = vmatpush1.bf16.msra.mxu0 %v1305_v21 }
  0x8e   :  { %903 = vmatprep.subr.bf16.mxu0 %v1310_v22 }
  0x91   :  { %904 = vmatpush1.bf16.msra.mxu0 %v1308_v24 }
  0x92   :  { %905 = vmatprep.subr.bf16.mxu0 %v1313_v25 }
  0x95   :  { %906 = vmatpush1.bf16.msra.mxu0 %v1311_v27 }
 0x106   :  { %v183_v33 = vpop.f32.mrb[0].mxu0 }
 0x107   :  { %v184_v34 = vadd.f32 %v183_v33, %v1565_v31  ;;  %v185_v35 = vpop.f32.mrb[1].mxu0 }
 0x108   :  { %v186_v36 = vadd.f32 %v185_v35, %v1568_v32  ;;  %v187_v37 = vpop.f32.mrb[2].mxu0 }
 0x109   :  { %v188_v38 = vadd.f32 %v187_v37, %v1565_v31  ;;  %v189_v39 = vpop.f32.mrb[3].mxu0  ;;  %v262_v41 = vmax.f32 %v184_v34, 0.0 }
 0x10a   :  { %v190_v40 = vadd.f32 %v189_v39, %v1568_v32  ;;  %v263_v43 = vmax.f32 %v186_v36, 0.0 }
 0x10b   :  { %v264_v42 = vmax.f32 %v188_v38, 0.0 }
 0x10c   :  { %v265_v44 = vmax.f32 %v190_v40, 0.0 }
 0x10d   :  { %v294_v45 = vpack.c.bf16 %v264_v42, %v262_v41 }
 0x10e   :  { %v193_v46 = vpop.f32.mrb[4].mxu0  ;;  %v295_v47 = vpack.c.bf16 %v265_v44, %v263_v43 }
 0x10f   :  { %v194_v48 = vadd.f32 %v193_v46, %v1565_v31  ;;  %v195_v49 = vpop.f32.mrb[5].mxu0 }
 0x110   :  { %v196_v50 = vadd.f32 %v195_v49, %v1568_v32  ;;  %v197_v51 = vpop.f32.mrb[6].mxu0  ;;  %546 = vmatprep.mubr.bf16.mxu1 %v295_v47 }
 0x111   :  { %v198_v52 = vadd.f32 %v197_v51, %v1565_v31  ;;  %v199_v53 = vpop.f32.mrb[7].mxu0  ;;  %547 = vmatmul.mubr.bf16.vlgmr.msra.gmra.mrb[0].mxu1 %v294_v45  ;;  %v266_v55 = vmax.f32 %v194_v48, 0.0 }
 0x112   :  { %v200_v54 = vadd.f32 %v199_v53, %v1568_v32  ;;  %v267_v57 = vmax.f32 %v196_v50, 0.0 }
 0x113   :  { %v268_v56 = vmax.f32 %v198_v52, 0.0 }
 0x114   :  { %v269_v58 = vmax.f32 %v200_v54, 0.0 }
 0x115   :  { %v296_v59 = vpack.c.bf16 %v268_v56, %v266_v55 }
 0x116   :  { %v297_v60 = vpack.c.bf16 %v269_v58, %v267_v57  ;;  %v203_v61 = vpop.f32.mrb[8].mxu0 }
 0x117   :  { %v204_v62 = vadd.f32 %v203_v61, %v1565_v31  ;;  %v205_v63 = vpop.f32.mrb[9].mxu0 }
 0x118   :  { %v206_v0 = vadd.f32 %v205_v63, %v1568_v32  ;;  %v207_v1 = vpop.f32.mrb[10].mxu0  ;;  %556 = vmatprep.mubr.bf16.mxu1 %v297_v60 }
 0x119   :  { %v208_v2 = vadd.f32 %v207_v1, %v1565_v31  ;;  %v209_v3 = vpop.f32.mrb[11].mxu0  ;;  %557 = vmatmul.mubr.bf16.gmra.mrb[4].mxu1 %v296_v59  ;;  %v270_v5 = vmax.f32 %v204_v62, 0.0 }
 0x11a   :  { %v210_v4 = vadd.f32 %v209_v3, %v1568_v32  ;;  %v271_v7 = vmax.f32 %v206_v0, 0.0 }
 0x11b   :  { %v272_v6 = vmax.f32 %v208_v2, 0.0 }
 0x11c   :  { %v273_v8 = vmax.f32 %v210_v4, 0.0 }
 0x11d   :  { %v298_v9 = vpack.c.bf16 %v272_v6, %v270_v5 }
 0x11e   :  { %v299_v10 = vpack.c.bf16 %v273_v8, %v271_v7  ;;  %v213_v11 = vpop.f32.mrb[12].mxu0 }
 0x11f   :  { %v214_v12 = vadd.f32 %v213_v11, %v1565_v31  ;;  %v215_v13 = vpop.f32.mrb[13].mxu0 }
 0x120   :  { %v216_v14 = vadd.f32 %v215_v13, %v1568_v32  ;;  %v217_v15 = vpop.f32.mrb[14].mxu0  ;;  %566 = vmatprep.mubr.bf16.mxu1 %v299_v10 }
 0x121   :  { %v218_v16 = vadd.f32 %v217_v15, %v1565_v31  ;;  %v219_v17 = vpop.f32.mrb[15].mxu0  ;;  %567 = vmatmul.mubr.bf16.gmra.mrb[8].mxu1 %v298_v9  ;;  %v274_v19 = vmax.f32 %v214_v12, 0.0 }
 0x122   :  { %v220_v18 = vadd.f32 %v219_v17, %v1568_v32  ;;  %v275_v21 = vmax.f32 %v216_v14, 0.0 }
 0x123   :  { %v276_v20 = vmax.f32 %v218_v16, 0.0 }
 0x124   :  { %v277_v22 = vmax.f32 %v220_v18, 0.0 }
 0x125   :  { %v300_v23 = vpack.c.bf16 %v276_v20, %v274_v19 }
 0x126   :  { %v301_v24 = vpack.c.bf16 %v277_v22, %v275_v21  ;;  %v223_v25 = vpop.f32.mrb[16].mxu0  ;;  %v1316_v22 = vld [vmem:[#allocation6 + $0xe4] ss:$8 sps:$4 sm:$0xff]  }
 0x127   :  { %v224_v27 = vadd.f32 %v223_v25, %v1565_v31  ;;  %v225_v29 = vpop.f32.mrb[17].mxu0  ;;  %907 = vmatprep.subr.bf16.mxu0 %v1316_v22  ;;  %v1317_v25 = vld [vmem:[#allocation6 + $0xf0] ss:$8 sps:$4 sm:$0xff]  }
 0x128   :  { %v226_v33 = vadd.f32 %v225_v29, %v1568_v32  ;;  %v227_v34 = vpop.f32.mrb[18].mxu0  ;;  %576 = vmatprep.mubr.bf16.mxu1 %v301_v24  ;;  %v1319_v24 = vld [vmem:[#allocation6 + $0xf4] ss:$8 sps:$4 sm:$0xff]  }
 0x129   :  { %v228_v35 = vadd.f32 %v227_v34, %v1565_v31  ;;  %v229_v36 = vpop.f32.mrb[19].mxu0  ;;  %577 = vmatmul.mubr.bf16.gmra.mrb[12].mxu1 %v300_v23  ;;  %v278_v38 = vmax.f32 %v224_v27, 0.0  ;;  %v1314_v23 = vld [vmem:[#allocation6 + $0xe0] ss:$8 sps:$4 sm:$0xff]  }
 0x12a   :  { %v230_v37 = vadd.f32 %v229_v36, %v1568_v32  ;;  %v279_v40 = vmax.f32 %v226_v33, 0.0  ;;  %908 = vmatpush1.bf16.msra.mxu0 %v1314_v23 }
 0x12b   :  { %v280_v39 = vmax.f32 %v228_v35, 0.0  ;;  %909 = vmatprep.subr.bf16.mxu0 %v1319_v24 }
 0x12c   :  { %v281_v41 = vmax.f32 %v230_v37, 0.0 }
 0x12d   :  { %v302_v42 = vpack.c.bf16 %v280_v39, %v278_v38 }
 0x12e   :  { %v303_v43 = vpack.c.bf16 %v281_v41, %v279_v40  ;;  %v233_v44 = vpop.f32.mrb[20].mxu0  ;;  %910 = vmatpush1.bf16.msra.mxu0 %v1317_v25 }
 0x12f   :  { %v234_v45 = vadd.f32 %v233_v44, %v1565_v31  ;;  %v235_v46 = vpop.f32.mrb[21].mxu0 }
 0x130   :  { %v236_v47 = vadd.f32 %v235_v46, %v1568_v32  ;;  %v237_v48 = vpop.f32.mrb[22].mxu0  ;;  %586 = vmatprep.mubr.bf16.mxu1 %v303_v43 }
 0x131   :  { %v238_v49 = vadd.f32 %v237_v48, %v1565_v31  ;;  %v239_v50 = vpop.f32.mrb[23].mxu0  ;;  %587 = vmatmul.mubr.bf16.gmra.mrb[16].mxu1 %v302_v42  ;;  %v282_v52 = vmax.f32 %v234_v45, 0.0 }
 0x132   :  { %v240_v51 = vadd.f32 %v239_v50, %v1568_v32  ;;  %v283_v54 = vmax.f32 %v236_v47, 0.0 }
 0x133   :  { %v284_v53 = vmax.f32 %v238_v49, 0.0 }
 0x134   :  { %v285_v55 = vmax.f32 %v240_v51, 0.0 }
 0x135   :  { %v304_v56 = vpack.c.bf16 %v284_v53, %v282_v52 }
 0x136   :  { %v305_v57 = vpack.c.bf16 %v285_v55, %v283_v54  ;;  %v243_v58 = vpop.f32.mrb[24].mxu0 }
 0x137   :  { %v244_v59 = vadd.f32 %v243_v58, %v1565_v31  ;;  %v245_v60 = vpop.f32.mrb[25].mxu0 }
 0x138   :  { %v246_v61 = vadd.f32 %v245_v60, %v1568_v32  ;;  %v247_v62 = vpop.f32.mrb[26].mxu0  ;;  %596 = vmatprep.mubr.bf16.mxu1 %v305_v57 }
 0x139   :  { %v248_v63 = vadd.f32 %v247_v62, %v1565_v31  ;;  %v249_v0 = vpop.f32.mrb[27].mxu0  ;;  %597 = vmatmul.mubr.bf16.gmra.mrb[20].mxu1 %v304_v56  ;;  %v286_v2 = vmax.f32 %v244_v59, 0.0 }
 0x13a   :  { %v250_v1 = vadd.f32 %v249_v0, %v1568_v32  ;;  %v287_v4 = vmax.f32 %v246_v61, 0.0 }
 0x13b   :  { %v288_v3 = vmax.f32 %v248_v63, 0.0 }
 0x13c   :  { %v289_v5 = vmax.f32 %v250_v1, 0.0 }
 0x13d   :  { %v306_v6 = vpack.c.bf16 %v288_v3, %v286_v2 }
 0x13e   :  { %v307_v7 = vpack.c.bf16 %v289_v5, %v287_v4  ;;  %v253_v8 = vpop.f32.mrb[28].mxu0 }
 0x13f   :  { %v254_v9 = vadd.f32 %v253_v8, %v1565_v31  ;;  %v255_v10 = vpop.f32.mrb[29].mxu0 }
 0x140   :  { %v256_v11 = vadd.f32 %v255_v10, %v1568_v32  ;;  %v257_v12 = vpop.f32.mrb[30].mxu0  ;;  %606 = vmatprep.mubr.bf16.mxu1 %v307_v7 }
 0x141   :  { %v258_v13 = vadd.f32 %v257_v12, %v1565_v31  ;;  %v259_v14 = vpop.f32.mrb[31].mxu0  ;;  %607 = vmatmul.mubr.bf16.gmra.mrb[24].mxu1 %v306_v6  ;;  %v290_v16 = vmax.f32 %v254_v9, 0.0  ;;  %v342_v31 = vld [vmem:[%s1717_s4] sm:$0x3] }
 0x142   :  { %v260_v15 = vadd.f32 %v259_v14, %v1568_v32  ;;  %v291_v18 = vmax.f32 %v256_v11, 0.0  ;;  %v1606_v32 = vrot.slane %v342_v31, %v1556_v28  ;;  %v1609_v27 = vrot.slane %v342_v31, %v1562_v30 }
 0x143   :  { %v292_v17 = vmax.f32 %v258_v13, 0.0 }
 0x144   :  { %v293_v19 = vmax.f32 %v260_v15, 0.0 }
 0x145   :  { %v308_v20 = vpack.c.bf16 %v292_v17, %v290_v16 }
 0x146   :  { %v309_v21 = vpack.c.bf16 %v293_v19, %v291_v18 }
 0x148   :  { %616 = vmatprep.mubr.bf16.mxu1 %v309_v21 }
 0x149   :  { %617 = vmatmul.mubr.bf16.gmra.mrb[28].mxu1 %v308_v20 }
 0x1e4   :  { %v548_v29 = vpop.f32.mrb[0].mxu1 }
 0x1e5   :  { %v549_v33 = vadd.f32 %v548_v29, %v1606_v32  ;;  %v550_v34 = vpop.f32.mrb[1].mxu1 }
 0x1e6   :  { %v551_v35 = vadd.f32 %v550_v34, %v1609_v27  ;;  %v552_v36 = vpop.f32.mrb[2].mxu1 }
 0x1e7   :  { %v553_v37 = vadd.f32 %v552_v36, %v1606_v32  ;;  %v554_v38 = vpop.f32.mrb[3].mxu1  ;;  %v627_v40 = vmax.f32 %v549_v33, 0.0 }
 0x1e8   :  { %v555_v39 = vadd.f32 %v554_v38, %v1609_v27  ;;  %v628_v42 = vmax.f32 %v551_v35, 0.0 }
 0x1e9   :  { %v629_v41 = vmax.f32 %v553_v37, 0.0 }
 0x1ea   :  { %v630_v43 = vmax.f32 %v555_v39, 0.0 }
 0x1eb   :  { %v659_v44 = vpack.c.bf16 %v629_v41, %v627_v40 }
 0x1ec   :  { %v660_v45 = vpack.c.bf16 %v630_v43, %v628_v42  ;;  %v558_v46 = vpop.f32.mrb[4].mxu1 }
 0x1ed   :  { %v559_v47 = vadd.f32 %v558_v46, %v1606_v32  ;;  %v560_v48 = vpop.f32.mrb[5].mxu1 }
 0x1ee   :  { %v561_v49 = vadd.f32 %v560_v48, %v1609_v27  ;;  %v562_v50 = vpop.f32.mrb[6].mxu1  ;;  %911 = vmatprep.mubr.bf16.mxu0 %v660_v45 }
 0x1ef   :  { %v563_v51 = vadd.f32 %v562_v50, %v1606_v32  ;;  %v564_v52 = vpop.f32.mrb[7].mxu1  ;;  %912 = vmatmul.mubr.bf16.vlgmr.msra.gmra.mrb[32].mxu0 %v659_v44  ;;  %v631_v54 = vmax.f32 %v559_v47, 0.0 }
 0x1f0   :  { %v565_v53 = vadd.f32 %v564_v52, %v1609_v27  ;;  %v632_v56 = vmax.f32 %v561_v49, 0.0 }
 0x1f1   :  { %v633_v55 = vmax.f32 %v563_v51, 0.0 }
 0x1f2   :  { %v634_v57 = vmax.f32 %v565_v53, 0.0 }
 0x1f3   :  { %v661_v58 = vpack.c.bf16 %v633_v55, %v631_v54 }
 0x1f4   :  { %v662_v59 = vpack.c.bf16 %v634_v57, %v632_v56  ;;  %v568_v60 = vpop.f32.mrb[8].mxu1 }
 0x1f5   :  { %v569_v61 = vadd.f32 %v568_v60, %v1606_v32  ;;  %v570_v62 = vpop.f32.mrb[9].mxu1 }
 0x1f6   :  { %v571_v63 = vadd.f32 %v570_v62, %v1609_v27  ;;  %v572_v0 = vpop.f32.mrb[10].mxu1  ;;  %921 = vmatprep.mubr.bf16.mxu0 %v662_v59 }
 0x1f7   :  { %v573_v1 = vadd.f32 %v572_v0, %v1606_v32  ;;  %v574_v2 = vpop.f32.mrb[11].mxu1  ;;  %922 = vmatmul.mubr.bf16.gmra.mrb[36].mxu0 %v661_v58  ;;  %v635_v4 = vmax.f32 %v569_v61, 0.0 }
 0x1f8   :  { %v575_v3 = vadd.f32 %v574_v2, %v1609_v27  ;;  %v636_v6 = vmax.f32 %v571_v63, 0.0 }
 0x1f9   :  { %v637_v5 = vmax.f32 %v573_v1, 0.0 }
 0x1fa   :  { %v638_v7 = vmax.f32 %v575_v3, 0.0 }
 0x1fb   :  { %v663_v8 = vpack.c.bf16 %v637_v5, %v635_v4 }
 0x1fc   :  { %v664_v9 = vpack.c.bf16 %v638_v7, %v636_v6  ;;  %v578_v10 = vpop.f32.mrb[12].mxu1 }
 0x1fd   :  { %v579_v11 = vadd.f32 %v578_v10, %v1606_v32  ;;  %v580_v12 = vpop.f32.mrb[13].mxu1 }
 0x1fe   :  { %v581_v13 = vadd.f32 %v580_v12, %v1609_v27  ;;  %v582_v14 = vpop.f32.mrb[14].mxu1  ;;  %931 = vmatprep.mubr.bf16.mxu0 %v664_v9 }
 0x1ff   :  { %v583_v15 = vadd.f32 %v582_v14, %v1606_v32  ;;  %v584_v16 = vpop.f32.mrb[15].mxu1  ;;  %932 = vmatmul.mubr.bf16.gmra.mrb[40].mxu0 %v663_v8  ;;  %v639_v18 = vmax.f32 %v579_v11, 0.0 }
 0x200   :  { %v585_v17 = vadd.f32 %v584_v16, %v1609_v27  ;;  %v640_v20 = vmax.f32 %v581_v13, 0.0 }
 0x201   :  { %v641_v19 = vmax.f32 %v583_v15, 0.0 }
 0x202   :  { %v642_v21 = vmax.f32 %v585_v17, 0.0 }
 0x203   :  { %v665_v22 = vpack.c.bf16 %v641_v19, %v639_v18 }
 0x204   :  { %v666_v23 = vpack.c.bf16 %v642_v21, %v640_v20  ;;  %v588_v24 = vpop.f32.mrb[16].mxu1  ;;  %v1397_v21 = vmov 1966171168  }
 0x205   :  { %v589_v25 = vadd.f32 %v588_v24, %v1606_v32  ;;  %v590_v31 = vpop.f32.mrb[17].mxu1 }
 0x206   :  { %v591_v29 = vadd.f32 %v590_v31, %v1609_v27  ;;  %v592_v33 = vpop.f32.mrb[18].mxu1  ;;  %941 = vmatprep.mubr.bf16.mxu0 %v666_v23  ;;  %v1646_v23 = vld.sshfl [vmem:[%s1720_s7] sm:$0x11 pattern:$0x75316420] }
 0x207   :  { %v593_v34 = vadd.f32 %v592_v33, %v1606_v32  ;;  %v594_v35 = vpop.f32.mrb[19].mxu1  ;;  %942 = vmatmul.mubr.bf16.gmra.mrb[44].mxu0 %v665_v22  ;;  %v643_v37 = vmax.f32 %v589_v25, 0.0  ;;  %v1061_v22 = vunpack.c.l.s4 %v1397_v21  ;;  %v1059_v24 = vcombine.high %v1646_v23, %v1646_v23  ;;  %v707_v33 = vld [vmem:[%s1719_s6] sm:$0x3]  ;;  %s1398_s6 = smov [#allocation8]  }
 0x208   :  { %v595_v36 = vadd.f32 %v594_v35, %v1609_v27  ;;  %v644_v39 = vmax.f32 %v591_v29, 0.0  ;;  %v1041_v29 = vld [vmem:[#allocation2] sm:$0x1]  ;;  %v1663_v35 = vrot.slane %v707_v33, %v1562_v30  ;;  %s1123_s7 = sshll.u32 %s1398_s6, 4  ;;  %s1124_s7 = int_to_ptr.vmem [resolvable:$true] %s1123_s7 }
 0x209   :  { %v645_v38 = vmax.f32 %v593_v34, 0.0  ;;  %1044 = vperm.xlu0 %1217, %v1041_v29   ;;  %v1660_v34 = vrot.slane %v707_v33, %v1556_v28  ;;  %s1364_s10 = scalar_lea.vmem %s1124_s7, 16  ;;  %s1368_s11 = scalar_lea.vmem %s1124_s7, 32 }
 0x20a   :  { %v646_v40 = vmax.f32 %v595_v36, 0.0  ;;  %p1365_p2 = scmp.ne.s32.totalorder %s1124_s7, %s1364_s10  ;;  %p1369_p3 = scmp.lt.s32.totalorder %s1124_s7, %s1124_s7 }
 0x20b   :  { %v667_v41 = vpack.c.bf16 %v645_v38, %v643_v37  ;;  %p1370_p4 = scmp.lt.s32.totalorder %s1368_s11, %s1364_s10 }
 0x20c   :  { %v668_v42 = vpack.c.bf16 %v646_v40, %v644_v39  ;;  %v598_v43 = vpop.f32.mrb[20].mxu1 }
 0x20d   :  { %v599_v44 = vadd.f32 %v598_v43, %v1606_v32  ;;  %v600_v45 = vpop.f32.mrb[21].mxu1  ;;  %p1371_p5 = por %p1370_p4, %p1369_p3 }
 0x20e   :  { %v601_v46 = vadd.f32 %v600_v45, %v1609_v27  ;;  %v602_v47 = vpop.f32.mrb[22].mxu1  ;;  %951 = vmatprep.mubr.bf16.mxu0 %v668_v42 }
 0x20f   :  { %v603_v48 = vadd.f32 %v602_v47, %v1606_v32  ;;  %v604_v49 = vpop.f32.mrb[23].mxu1  ;;  %952 = vmatmul.mubr.bf16.gmra.mrb[48].mxu0 %v667_v41  ;;  %v647_v51 = vmax.f32 %v599_v44, 0.0  ;;  %p1372_p6 = pnand %p1371_p5, %p1365_p2 }
 0x210   :  { %v605_v50 = vadd.f32 %v604_v49, %v1609_v27  ;;  %v648_v53 = vmax.f32 %v601_v46, 0.0 }
 0x211   :  { %v649_v52 = vmax.f32 %v603_v48, 0.0 }
 0x212   :  { %v650_v54 = vmax.f32 %v605_v50, 0.0 }
 0x213   :  { %v669_v55 = vpack.c.bf16 %v649_v52, %v647_v51 }
 0x214   :  { %v670_v56 = vpack.c.bf16 %v650_v54, %v648_v53  ;;  %v608_v57 = vpop.f32.mrb[24].mxu1 }
 0x215   :  { %v609_v58 = vadd.f32 %v608_v57, %v1606_v32  ;;  %v610_v59 = vpop.f32.mrb[25].mxu1 }
 0x216   :  { %v611_v60 = vadd.f32 %v610_v59, %v1609_v27  ;;  %v612_v61 = vpop.f32.mrb[26].mxu1  ;;  %961 = vmatprep.mubr.bf16.mxu0 %v670_v56 }
 0x217   :  { %v613_v62 = vadd.f32 %v612_v61, %v1606_v32  ;;  %v614_v63 = vpop.f32.mrb[27].mxu1  ;;  %962 = vmatmul.mubr.bf16.gmra.mrb[52].mxu0 %v669_v55  ;;  %v651_v1 = vmax.f32 %v609_v58, 0.0 }
 0x218   :  { %v615_v0 = vadd.f32 %v614_v63, %v1609_v27  ;;  %v652_v3 = vmax.f32 %v611_v60, 0.0 }
 0x219   :  { %v653_v2 = vmax.f32 %v613_v62, 0.0 }
 0x21a   :  { %v654_v4 = vmax.f32 %v615_v0, 0.0 }
 0x21b   :  { %v671_v5 = vpack.c.bf16 %v653_v2, %v651_v1 }
 0x21c   :  { %v672_v6 = vpack.c.bf16 %v654_v4, %v652_v3  ;;  %v618_v7 = vpop.f32.mrb[28].mxu1 }
 0x21d   :  { %v619_v8 = vadd.f32 %v618_v7, %v1606_v32  ;;  %v620_v9 = vpop.f32.mrb[29].mxu1 }
 0x21e   :  { %v621_v10 = vadd.f32 %v620_v9, %v1609_v27  ;;  %v622_v11 = vpop.f32.mrb[30].mxu1  ;;  %971 = vmatprep.mubr.bf16.mxu0 %v672_v6 }
 0x21f   :  { %v623_v12 = vadd.f32 %v622_v11, %v1606_v32  ;;  %v624_v13 = vpop.f32.mrb[31].mxu1  ;;  %972 = vmatmul.mubr.bf16.gmra.mrb[56].mxu0 %v671_v5  ;;  %v655_v15 = vmax.f32 %v619_v8, 0.0  ;;  %v1062_v32 = vunpack.c.0.s8 %v1061_v22 }
 0x220   :  { %v625_v14 = vadd.f32 %v624_v13, %v1609_v27  ;;  %v656_v17 = vmax.f32 %v621_v10, 0.0 }
 0x221   :  { %v657_v16 = vmax.f32 %v623_v12, 0.0  ;;  %v1651_v27 = vsub.s32 %v1062_v32, %v1553_v26 }
 0x222   :  { %v658_v18 = vmax.f32 %v625_v14, 0.0 }
 0x223   :  { %v673_v19 = vpack.c.bf16 %v657_v16, %v655_v15  ;;  %v1066_v25 = vrot.slane %v1646_v23, %v1651_v27  ;;  %v1073_v31 = vrot.slane %v1059_v24, %v1651_v27 }
 0x224   :  { %v674_v20 = vpack.c.bf16 %v658_v18, %v656_v17 }
 0x225   :  { %1108 = vmatprep.mubr.bf16.mxu1 %v1073_v31 }
 0x226   :  { %981 = vmatprep.mubr.bf16.mxu0 %v674_v20 }
 0x227   :  { %982 = vmatmul.mubr.bf16.gmra.mrb[60].mxu0 %v673_v19 }
 0x2c2   :  { %v913_v26 = vpop.f32.mrb[32].mxu0 }
 0x2c3   :  { %v914_v36 = vadd.f32 %v913_v26, %v1660_v34  ;;  %v915_v37 = vpop.f32.mrb[33].mxu0 }
 0x2c4   :  { %v916_v38 = vadd.f32 %v915_v37, %v1663_v35  ;;  %v917_v39 = vpop.f32.mrb[34].mxu0 }
 0x2c5   :  { %v918_v40 = vadd.f32 %v917_v39, %v1660_v34  ;;  %v919_v41 = vpop.f32.mrb[35].mxu0  ;;  %v992_v43 = vmax.f32 %v914_v36, 0.0 }
 0x2c6   :  { %v920_v42 = vadd.f32 %v919_v41, %v1663_v35  ;;  %v993_v45 = vmax.f32 %v916_v38, 0.0 }
 0x2c7   :  { %v994_v44 = vmax.f32 %v918_v40, 0.0 }
 0x2c8   :  { %v995_v46 = vmax.f32 %v920_v42, 0.0 }
 0x2c9   :  { %v1025_v47 = vpack.c.bf16 %v994_v44, %v992_v43 }
 0x2ca   :  { %v1026_v48 = vpack.c.bf16 %v995_v46, %v993_v45  ;;  %v923_v30 = vpop.f32.mrb[36].mxu0 }
 0x2cb   :  { %v924_v49 = vadd.f32 %v923_v30, %v1660_v34  ;;  %v925_v50 = vpop.f32.mrb[37].mxu0 }
 0x2cc   :  { %v926_v51 = vadd.f32 %v925_v50, %v1663_v35  ;;  %v927_v52 = vpop.f32.mrb[38].mxu0  ;;  %1076 = vmatprep.subr.bf16.mxu1 %v1026_v48 }
 0x2cd   :  { %v928_v53 = vadd.f32 %v927_v52, %v1660_v34  ;;  %v929_v54 = vpop.f32.mrb[39].mxu0  ;;  %1077 = vmatpush1.bf16.xpose.msra.mxu1 %v1025_v47  ;;  %v996_v56 = vmax.f32 %v924_v49, 0.0 }
 0x2ce   :  { %v930_v55 = vadd.f32 %v929_v54, %v1663_v35  ;;  %v997_v58 = vmax.f32 %v926_v51, 0.0 }
 0x2cf   :  { %v998_v57 = vmax.f32 %v928_v53, 0.0 }
 0x2d0   :  { %v999_v59 = vmax.f32 %v930_v55, 0.0 }
 0x2d1   :  { %v1027_v60 = vpack.c.bf16 %v998_v57, %v996_v56 }
 0x2d2   :  { %v1028_v61 = vpack.c.bf16 %v999_v59, %v997_v58  ;;  %v933_v62 = vpop.f32.mrb[40].mxu0 }
 0x2d3   :  { %v934_v63 = vadd.f32 %v933_v62, %v1660_v34  ;;  %v935_v0 = vpop.f32.mrb[41].mxu0 }
 0x2d4   :  { %v936_v1 = vadd.f32 %v935_v0, %v1663_v35  ;;  %v937_v2 = vpop.f32.mrb[42].mxu0  ;;  %1078 = vmatprep.subr.bf16.mxu1 %v1028_v61 }
 0x2d5   :  { %v938_v3 = vadd.f32 %v937_v2, %v1660_v34  ;;  %v939_v4 = vpop.f32.mrb[43].mxu0  ;;  %1079 = vmatpush1.bf16.xpose.msra.mxu1 %v1027_v60  ;;  %v1000_v6 = vmax.f32 %v934_v63, 0.0 }
 0x2d6   :  { %v940_v5 = vadd.f32 %v939_v4, %v1663_v35  ;;  %v1001_v8 = vmax.f32 %v936_v1, 0.0 }
 0x2d7   :  { %v1002_v7 = vmax.f32 %v938_v3, 0.0 }
 0x2d8   :  { %v1003_v9 = vmax.f32 %v940_v5, 0.0 }
 0x2d9   :  { %v1029_v10 = vpack.c.bf16 %v1002_v7, %v1000_v6 }
 0x2da   :  { %v1030_v11 = vpack.c.bf16 %v1003_v9, %v1001_v8  ;;  %v943_v12 = vpop.f32.mrb[44].mxu0 }
 0x2db   :  { %v944_v13 = vadd.f32 %v943_v12, %v1660_v34  ;;  %v945_v14 = vpop.f32.mrb[45].mxu0 }
 0x2dc   :  { %v946_v15 = vadd.f32 %v945_v14, %v1663_v35  ;;  %v947_v16 = vpop.f32.mrb[46].mxu0  ;;  %1080 = vmatprep.subr.bf16.mxu1 %v1030_v11 }
 0x2dd   :  { %v948_v17 = vadd.f32 %v947_v16, %v1660_v34  ;;  %v949_v18 = vpop.f32.mrb[47].mxu0  ;;  %1081 = vmatpush1.bf16.xpose.msra.mxu1 %v1029_v10  ;;  %v1004_v20 = vmax.f32 %v944_v13, 0.0 }
 0x2de   :  { %v950_v19 = vadd.f32 %v949_v18, %v1663_v35  ;;  %v1005_v22 = vmax.f32 %v946_v15, 0.0 }
 0x2df   :  { %v1006_v21 = vmax.f32 %v948_v17, 0.0 }
 0x2e0   :  { %v1007_v32 = vmax.f32 %v950_v19, 0.0 }
 0x2e1   :  { %v1031_v24 = vpack.c.bf16 %v1006_v21, %v1004_v20 }
 0x2e2   :  { %v1032_v31 = vpack.c.bf16 %v1007_v32, %v1005_v22  ;;  %v953_v29 = vpop.f32.mrb[48].mxu0 }
 0x2e3   :  { %v954_v33 = vadd.f32 %v953_v29, %v1660_v34  ;;  %v955_v26 = vpop.f32.mrb[49].mxu0 }
 0x2e4   :  { %v956_v36 = vadd.f32 %v955_v26, %v1663_v35  ;;  %v957_v37 = vpop.f32.mrb[50].mxu0  ;;  %1082 = vmatprep.subr.bf16.mxu1 %v1032_v31 }
 0x2e5   :  { %v958_v38 = vadd.f32 %v957_v37, %v1660_v34  ;;  %v959_v39 = vpop.f32.mrb[51].mxu0  ;;  %1083 = vmatpush1.bf16.xpose.msra.mxu1 %v1031_v24  ;;  %v1008_v41 = vmax.f32 %v954_v33, 0.0  ;;  %v1045_v24 = vpop.permute.xlu0 %1044 }
 0x2e6   :  { %v960_v40 = vadd.f32 %v959_v39, %v1663_v35  ;;  %v1009_v43 = vmax.f32 %v956_v36, 0.0  ;;  %v1050_v31 = vrot.slane %v1045_v24, %v1556_v28 }
 0x2e7   :  { %v1010_v42 = vmax.f32 %v958_v38, 0.0 }
 0x2e8   :  { %v1011_v44 = vmax.f32 %v960_v40, 0.0 }
 0x2e9   :  { %v1033_v45 = vpack.c.bf16 %v1010_v42, %v1008_v41 }
 0x2ea   :  { %v1034_v46 = vpack.c.bf16 %v1011_v44, %v1009_v43  ;;  %v963_v47 = vpop.f32.mrb[52].mxu0 }
 0x2eb   :  { %v964_v48 = vadd.f32 %v963_v47, %v1660_v34  ;;  %v965_v30 = vpop.f32.mrb[53].mxu0 }
 0x2ec   :  { %v966_v49 = vadd.f32 %v965_v30, %v1663_v35  ;;  %v967_v50 = vpop.f32.mrb[54].mxu0  ;;  %1084 = vmatprep.subr.bf16.mxu1 %v1034_v46 }
 0x2ed   :  { %v968_v51 = vadd.f32 %v967_v50, %v1660_v34  ;;  %v969_v52 = vpop.f32.mrb[55].mxu0  ;;  %1085 = vmatpush1.bf16.xpose.msra.mxu1 %v1033_v45  ;;  %v1012_v54 = vmax.f32 %v964_v48, 0.0 }
 0x2ee   :  { %v970_v53 = vadd.f32 %v969_v52, %v1663_v35  ;;  %v1013_v56 = vmax.f32 %v966_v49, 0.0 }
 0x2ef   :  { %v1014_v55 = vmax.f32 %v968_v51, 0.0 }
 0x2f0   :  { %v1015_v57 = vmax.f32 %v970_v53, 0.0 }
 0x2f1   :  { %v1035_v58 = vpack.c.bf16 %v1014_v55, %v1012_v54 }
 0x2f2   :  { %v1036_v59 = vpack.c.bf16 %v1015_v57, %v1013_v56  ;;  %v973_v60 = vpop.f32.mrb[56].mxu0 }
 0x2f3   :  { %v974_v61 = vadd.f32 %v973_v60, %v1660_v34  ;;  %v975_v62 = vpop.f32.mrb[57].mxu0 }
 0x2f4   :  { %v976_v63 = vadd.f32 %v975_v62, %v1663_v35  ;;  %v977_v0 = vpop.f32.mrb[58].mxu0  ;;  %1086 = vmatprep.subr.bf16.mxu1 %v1036_v59 }
 0x2f5   :  { %v978_v1 = vadd.f32 %v977_v0, %v1660_v34  ;;  %v979_v2 = vpop.f32.mrb[59].mxu0  ;;  %1087 = vmatpush1.bf16.xpose.msra.mxu1 %v1035_v58  ;;  %v1016_v4 = vmax.f32 %v974_v61, 0.0 }
 0x2f6   :  { %v980_v3 = vadd.f32 %v979_v2, %v1663_v35  ;;  %v1017_v6 = vmax.f32 %v976_v63, 0.0 }
 0x2f7   :  { %v1018_v5 = vmax.f32 %v978_v1, 0.0 }
 0x2f8   :  { %v1019_v7 = vmax.f32 %v980_v3, 0.0 }
 0x2f9   :  { %v1037_v8 = vpack.c.bf16 %v1018_v5, %v1016_v4 }
 0x2fa   :  { %v1038_v9 = vpack.c.bf16 %v1019_v7, %v1017_v6  ;;  %v983_v10 = vpop.f32.mrb[60].mxu0 }
 0x2fb   :  { %v984_v11 = vadd.f32 %v983_v10, %v1660_v34  ;;  %v985_v12 = vpop.f32.mrb[61].mxu0 }
 0x2fc   :  { %v986_v13 = vadd.f32 %v985_v12, %v1663_v35  ;;  %v987_v14 = vpop.f32.mrb[62].mxu0  ;;  %1088 = vmatprep.subr.bf16.mxu1 %v1038_v9 }
 0x2fd   :  { %v988_v15 = vadd.f32 %v987_v14, %v1660_v34  ;;  %v989_v16 = vpop.f32.mrb[63].mxu0  ;;  %1089 = vmatpush1.bf16.xpose.msra.mxu1 %v1037_v8  ;;  %v1020_v18 = vmax.f32 %v984_v11, 0.0 }
 0x2fe   :  { %v990_v17 = vadd.f32 %v989_v16, %v1663_v35  ;;  %v1021_v20 = vmax.f32 %v986_v13, 0.0 }
 0x2ff   :  { %v1022_v19 = vmax.f32 %v988_v15, 0.0 }
 0x300   :  { %v1023_v21 = vmax.f32 %v990_v17, 0.0 }
 0x301   :  { %v1039_v22 = vpack.c.bf16 %v1022_v19, %v1020_v18 }
 0x302   :  { %v1040_v32 = vpack.c.bf16 %v1023_v21, %v1021_v20 }
 0x304   :  { %1090 = vmatprep.subr.bf16.mxu1 %v1040_v32 }
 0x305   :  { %1091 = vmatpush1.bf16.xpose.msra.mxu1 %v1039_v22 }
 0x30c   :  { %1109 = vmatmul.mubr.bf16.vlgmr.msra.gmra.mrb[32].mxu1 %v1066_v25 }
 0x3df   :  { %v1110_v34 = vpop.f32.mrb[32].mxu1 }
 0x3e0   :  { %v1111_v29 = vadd.f32 %v1110_v34, %v1050_v31  ;;  %v1112_v35 = vpop.f32.mrb[33].mxu1 }
 0x3e1   :  { %v1113_v33 = vpop.f32.mrb[34].mxu1 }
 0x3e2   :  { %1116 = vst [vmem:[#allocation8] sm:$0x1] %v1111_v29  ;;  %v1114_v26 = vpop.f32.mrb[35].mxu1 }
 0x3e3   :  { %1375 = shalt.err (!%p1372_p6)
}
 0x3e4   :  { %s1376_s12 = scalar_lea.hbm %s1722_s9, 16 }
 0x3e5   :  { %p1377_p7 = scmp.ne.s32.totalorder %s1722_s9, %s1376_s12  ;;  %p1380_p8 = scmp.lt.u32.totalorder %s1376_s12, %s1722_s9 }
 0x3e7   :  { %p1382_p9 = pnand %p1380_p8, %p1377_p7 }
 0x3e9   :  { %1385 = shalt.err (!%p1382_p9)
}
 0x3ea   :  { %1126 = dma.vmem_to_hbm [thread:$0]  %s1124_s7, 16, %s1722_s9, [#allocation5]  }
 0x3eb   :  { %1390 = dma.done.wait [#allocation5], 16  }
 0x3ec   :  { %1391 = vsyncadd [#allocation5], 4294967280 }
 0x3ed   :  { %1130 = vsyncpa [#allocation4], 1 }
 0x3ee   :  { %1131 = vsyncpa [#allocation7], 1 }
 0x3ef   :  { %1132 = vsyncpa [#allocation5], 1 }

</bundles_post_ra>
